<compile_context>
chip_gen: v6e
topology: v6e:2x2x1
jax: 0.10.0
libtpu: 0.0.40
codegen_flags: <defaults>
</compile_context>

<pallas_src>
import functools

import jax
import jax.numpy as jnp
from jax import lax
from jax.experimental import pallas as pl
from jax.experimental.pallas import tpu as pltpu


def _round_up(a, m):
    return -(-a // m) * m


def _instance_score_kernel(x_ref, w1_ref, b1_ref, w2_ref, o_ref,
                           m_ref, l_ref, mt_ref,
                           *, n_actual, tn, num_n, use_bf16):
    # x_ref  : (TB, C, TN)     one batch-tile x sequence-tile of x
    # w1_ref : (H, C)          Conv1d(C -> H, k=1) weight (resident)
    # b1_ref : (H, 1)          Conv1d(C -> H, k=1) bias
    # w2_ref : (H, 1)          Conv1d(H -> 1, k=1) weight (column)
    # o_ref  : (1, TB, Npad)   resident across the sequence axis; holds
    #                          exp(s - running_max) during the sweep, the
    #                          final softmax after the last tile.
    # m_ref  : (TB, 1)         running row max                        (f32)
    # l_ref  : (TB, 1)         running row sum of exp(s - run_max)    (f32)
    # mt_ref : (num_n, TB, 1)  running-max snapshot per stored tile   (f32)
    j = pl.program_id(1)
    tb = x_ref.shape[0]

    @pl.when(j == 0)
    def _init():
        m_ref[...] = jnp.full_like(m_ref, -1e30)
        l_ref[...] = jnp.zeros_like(l_ref)

    w1 = w1_ref[...]
    if use_bf16:
        w1 = w1.astype(jnp.bfloat16)
    b1 = b1_ref[...]                                    # (H, 1) f32
    w2 = w2_ref[...]                                    # (H, 1) f32

    # ---- raw scores for this (batch-tile, sequence-tile) block -------------
    rows = []
    for b in range(tb):                                 # static <=8 unroll
        x_b = x_ref[b]                                  # (C, TN)
        if use_bf16:
            x_b = x_b.astype(jnp.bfloat16)
        h = jnp.dot(w1, x_b, preferred_element_type=jnp.float32)   # MXU
        h = jnp.tanh(h + b1)                                       # f32 VPU/EUP
        # Conv1d(H -> 1): VPU multiply + XLU sublane reduce (b2 dropped).
        rows.append(jnp.sum(w2 * h, axis=0, keepdims=True))        # (1, TN)
    s = jnp.concatenate(rows, axis=0)                   # (TB, TN) dense tile

    if num_n * tn > n_actual:                           # ragged N tail: mask
        lane = lax.broadcasted_iota(jnp.int32, (1, tn), 1)
        s = jnp.where(lane + j * tn < n_actual, s, -1e30)

    # ---- online softmax update ----------------------------------------------
    m_prev = m_ref[...]
    m_new = jnp.maximum(m_prev, jnp.max(s, axis=1, keepdims=True))  # (TB, 1)
    e = jnp.exp(s - m_new)                                          # (TB, TN)
    l_ref[...] = l_ref[...] * jnp.exp(m_prev - m_new) + jnp.sum(
        e, axis=1, keepdims=True)
    m_ref[...] = m_new
    mt_ref[j] = m_new

    # one dense lane-aligned (TB, TN) store into the resident output block
    if num_n == 1:
        o_ref[0] = e
    else:
        start = pl.multiple_of(j * tn, 128)             # tn % 128 == 0 here
        o_ref[0, :, pl.ds(start, tn)] = e

    # ---- finalize: rescale every stored tile to the global max & normalize --
    @pl.when(j == num_n - 1)
    def _finalize():
        m_fin = m_ref[...]
        inv_l = 1.0 / l_ref[...]                        # exact: rows sum to 1
        if num_n == 1:
            o_ref[0] = o_ref[0] * (jnp.exp(mt_ref[0] - m_fin) * inv_l)
        else:
            def body(jt, carry):
                st = pl.multiple_of(jt * tn, 128)
                scale = jnp.exp(mt_ref[jt] - m_fin) * inv_l          # (TB, 1)
                o_ref[0, :, pl.ds(st, tn)] = o_ref[0, :, pl.ds(st, tn)] * scale
                return carry
            lax.fori_loop(0, num_n, body, 0)


def _vmem_limit_bytes():
    """Generation-aware scoped-VMEM limit: ~81% of physical capacity
    (v5e/v6e: ~104 MiB of 128; v7x: ~52 MiB of 64) -- leaves headroom for
    Mosaic internal scratch and the double-buffered weight blocks."""
    try:
        cap = int(pltpu.get_tpu_info().vmem_capacity_bytes)
    except Exception:
        cap = 64 * 1024 * 1024                          # conservative fallback
    return (cap * 13) // 16


def _choose_tiles(B, C, N, H, x_bytes, max_seq_tile=None):
    vmem_limit = _vmem_limit_bytes()

    # Batch tile: largest divisor of B in {8,4,2,1}  ->  no batch padding.
    tb = 1
    for cand in (8, 4, 2):
        if B % cand == 0:
            tb = cand
            break
    # Keep >=2 entries on the parallel axis so both v7x TensorCores get work.
    while tb > 1 and B // tb < 2:
        tb //= 2
    # Resident (double-buffered) output block scales with N; keep it to a
    # fraction of VMEM so the x tile still gets wide (>=512-lane) DMAs.
    while tb > 1 and 2 * tb * _round_up(N, 128) * 4 > vmem_limit // 3:
        tb //= 2
    # TODO(synk): for extreme N where even tb=1 residency exceeds v7x's 64 MiB,
    # restructure into two passes (raw scores + per-row stats, then normalize).

    # Sequence tile: use most of the remaining VMEM, multiple of 128 lanes.
    resident_out = 2 * tb * _round_up(N, 128) * 4
    weights = 2 * (H * C + 2 * H) * 4
    budget = vmem_limit - resident_out - weights - (1 << 20)
    per_lane = 2 * tb * C * x_bytes + (H + 3 * tb) * 4
    tn = budget // max(per_lane, 1)
    if max_seq_tile is not None:
        tn = min(tn, max_seq_tile)
    if tn >= N:
        tn = N                                          # single full-width tile
    else:
        tn = max(128, min((tn // 128) * 128, 4096))
    return tb, tn, vmem_limit


def instance_score(x, w1, b1, w2, b2=None, *, use_bf16_matmul=True,
                   max_seq_tile=None):
    """x: (B, C, N) -> (B, N) softmax attention scores (InstanceScore.forward).

    w1: (H, C) = Conv1d(C, C//2, 1).weight.squeeze(-1),  b1: (H,)
    w2: (1, H) = Conv1d(C//2, 1, 1).weight.squeeze(-1),  b2: (1,) -- unused
        (adding a scalar before softmax does not change the output).
    """
    del b2                                              # softmax(s + c) == softmax(s)
    B, C, N = x.shape
    H = w1.shape[0]

    tb, tn, vmem_limit = _choose_tiles(B, C, N, H, x.dtype.itemsize,
                                       max_seq_tile=max_seq_tile)
    num_b = B // tb
    num_n = -(-N // tn)
    n_pad = num_n * tn
    assert num_n == 1 or tn % 128 == 0

    kernel = functools.partial(_instance_score_kernel, n_actual=N, tn=tn,
                               num_n=num_n, use_bf16=use_bf16_matmul)

    out = pl.pallas_call(
        kernel,
        out_shape=jax.ShapeDtypeStruct((num_b, tb, n_pad), jnp.float32),
        grid_spec=pltpu.PrefetchScalarGridSpec(
            num_scalar_prefetch=0,
            grid=(num_b, num_n),
            in_specs=[
                pl.BlockSpec((tb, C, tn), lambda i, j: (i, 0, j)),   # x tile
                pl.BlockSpec((H, C), lambda i, j: (0, 0)),           # w1 (resident)
                pl.BlockSpec((H, 1), lambda i, j: (0, 0)),           # b1
                pl.BlockSpec((H, 1), lambda i, j: (0, 0)),           # w2 (column)
            ],
            out_specs=pl.BlockSpec((1, tb, n_pad), lambda i, j: (i, 0, 0)),
            scratch_shapes=[
                pltpu.VMEM((tb, 1), jnp.float32),         # running max
                pltpu.VMEM((tb, 1), jnp.float32),         # running sum
                pltpu.VMEM((num_n, tb, 1), jnp.float32),  # per-tile max snapshot
            ],
        ),
        compiler_params=pltpu.CompilerParams(
            dimension_semantics=("parallel", "arbitrary"),
            vmem_limit_bytes=vmem_limit,
        ),
    )(x, w1, b1.reshape(H, 1).astype(jnp.float32),
      w2.reshape(H, 1).astype(jnp.float32))

    out = out.reshape(B, n_pad)
    if n_pad != N:
        out = out[:, :N]                                # cheap vs. reading x
    if out.dtype != x.dtype:
        out = out.astype(x.dtype)
    return out


def instance_score_ref(x, w1, b1, w2, b2):
    """Pure-JAX f32 reference for correctness check."""
    h = jnp.tanh(jnp.einsum("hc,bcn->bhn", w1, x) + b1[None, :, None])
    s = jnp.einsum("oh,bhn->bon", w2, h) + b2[None, :, None]
    return jax.nn.softmax(s[:, 0, :], axis=-1)


if __name__ == "__main__":
    key = jax.random.PRNGKey(0)

    def make_inputs(B, C, N, key):
        H = C // 2
        kx, kw1, kb1, kw2, kb2 = jax.random.split(key, 5)
        x = jax.random.normal(kx, (B, C, N), dtype=jnp.float32)
        # PyTorch Conv1d default init: U(-1/sqrt(fan_in), +1/sqrt(fan_in)).
        bound1 = 1.0 / float(C) ** 0.5
        w1 = jax.random.uniform(kw1, (H, C), jnp.float32, -bound1, bound1)
        b1 = jax.random.uniform(kb1, (H,), jnp.float32, -bound1, bound1)
        bound2 = 1.0 / float(H) ** 0.5
        w2 = jax.random.uniform(kw2, (1, H), jnp.float32, -bound2, bound2)
        b2 = jax.random.uniform(kb2, (1,), jnp.float32, -bound2, bound2)
        return x, w1, b1, w2, b2

    # --- test 1: small shape, single sequence tile ---------------------------
    B, C, N = 2, 4, 16
    x, w1, b1, w2, b2 = make_inputs(B, C, N, key)
    out = jax.block_until_ready(instance_score(x, w1, b1, w2, b2))
    ref = instance_score_ref(x, w1, b1, w2, b2)
    assert out.shape == (B, N)
    assert jnp.allclose(out, ref, atol=2e-3, rtol=2e-2), "mismatch vs reference"
    assert jnp.allclose(jnp.sum(out, axis=-1), 1.0, atol=1e-3), "rows must sum to 1"

    # --- test 2: multi-tile + ragged N tail (forced small seq tile) ----------
    B2, C2, N2 = 4, 4, 300
    x2, w12, b12, w22, b22 = make_inputs(B2, C2, N2, jax.random.PRNGKey(1))
    out2 = jax.block_until_ready(
        instance_score(x2, w12, b12, w22, b22, max_seq_tile=128))
    ref2 = instance_score_ref(x2, w12, b12, w22, b22)
    assert out2.shape == (B2, N2)
    assert jnp.allclose(out2, ref2, atol=2e-3, rtol=2e-2), "mismatch (ragged)"
    assert jnp.allclose(jnp.sum(out2, axis=-1), 1.0, atol=1e-3), "rows must sum to 1"

    print("KERNEL_OK")
</pallas_src>

<mosaic_0001>
module attributes {stable_mosaic.version = 11 : i64} {
  func.func @_instance_score_kernel(%arg0: i32, %arg1: i32, %arg2: memref<1x4x16xf32, #tpu.memory_space<vmem>>, %arg3: memref<2x4xf32, #tpu.memory_space<vmem>>, %arg4: memref<2x1xf32, #tpu.memory_space<vmem>>, %arg5: memref<2x1xf32, #tpu.memory_space<vmem>>, %arg6: memref<1x1x16xf32, #tpu.memory_space<vmem>>, %arg7: memref<1x1xf32, #tpu.memory_space<vmem>>, %arg8: memref<1x1xf32, #tpu.memory_space<vmem>>, %arg9: memref<1x1x1xf32, #tpu.memory_space<vmem>>) attributes {dimension_semantics = [#tpu.dimension_semantics<parallel>, #tpu.dimension_semantics<arbitrary>], iteration_bounds = array<i64: 2, 1>, scalar_prefetch = 0 : i64, scratch_operands = 3 : i64, tpu.core_type = #tpu.core_type<tc>, window_params = [{transform_indices = @transform_0, window_bounds = array<i64: 1, 4, 16>}, {pipeline_mode = #tpu.pipeline_mode<synchronous>, transform_indices = @transform_1, window_bounds = array<i64: 2, 4>}, {pipeline_mode = #tpu.pipeline_mode<synchronous>, transform_indices = @transform_2, window_bounds = array<i64: 2, 1>}, {pipeline_mode = #tpu.pipeline_mode<synchronous>, transform_indices = @transform_3, window_bounds = array<i64: 2, 1>}, {transform_indices = @transform_4, window_bounds = array<i64: 1, 1, 16>}]} {
    %c0_i32 = arith.constant 0 : i32
    %0 = arith.cmpi eq, %arg1, %c0_i32 : i32
    %1 = arith.extui %0 : i1 to i32
    %c0_i32_0 = arith.constant 0 : i32
    %2 = arith.cmpi ne, %1, %c0_i32_0 : i32
    scf.if %2 {
      %cst_27 = arith.constant -1.000000e+30 : f32
      %44 = vector.broadcast %cst_27 : f32 to vector<1x1xf32>
      %c0_28 = arith.constant 0 : index
      %c0_29 = arith.constant 0 : index
      %45 = vector.load %arg7[%c0_28, %c0_29] : memref<1x1xf32, #tpu.memory_space<vmem>>, vector<1x1xf32>
      tpu.vector_store %arg7[%c0_28, %c0_29], %44 {strides = array<i32>} : memref<1x1xf32, #tpu.memory_space<vmem>>, vector<1x1xf32>,
      %cst_30 = arith.constant 0.000000e+00 : f32
      %46 = vector.broadcast %cst_30 : f32 to vector<1x1xf32>
      %c0_31 = arith.constant 0 : index
      %c0_32 = arith.constant 0 : index
      %47 = vector.load %arg8[%c0_31, %c0_32] : memref<1x1xf32, #tpu.memory_space<vmem>>, vector<1x1xf32>
      tpu.vector_store %arg8[%c0_31, %c0_32], %46 {strides = array<i32>} : memref<1x1xf32, #tpu.memory_space<vmem>>, vector<1x1xf32>,
    } else {
    }
    %c0 = arith.constant 0 : index
    %c0_1 = arith.constant 0 : index
    %3 = vector.load %arg3[%c0, %c0_1] : memref<2x4xf32, #tpu.memory_space<vmem>>, vector<2x4xf32>
    %4 = arith.truncf %3 : vector<2x4xf32> to vector<2x4xbf16>
    %c0_2 = arith.constant 0 : index
    %c0_3 = arith.constant 0 : index
    %5 = vector.load %arg4[%c0_2, %c0_3] : memref<2x1xf32, #tpu.memory_space<vmem>>, vector<2x1xf32>
    %c0_4 = arith.constant 0 : index
    %c0_5 = arith.constant 0 : index
    %6 = vector.load %arg5[%c0_4, %c0_5] : memref<2x1xf32, #tpu.memory_space<vmem>>, vector<2x1xf32>
    %c0_6 = arith.constant 0 : index
    %c0_7 = arith.constant 0 : index
    %c0_8 = arith.constant 0 : index
    %7 = vector.load %arg2[%c0_6, %c0_7, %c0_8] : memref<1x4x16xf32, #tpu.memory_space<vmem>>, vector<1x4x16xf32>
    %8 = vector.shape_cast %7 : vector<1x4x16xf32> to vector<4x16xf32>
    %9 = arith.truncf %8 : vector<4x16xf32> to vector<4x16xbf16>
    %cst = arith.constant dense<0.000000e+00> : vector<2x16xf32>
    %10 = tpu.matmul %4, %9, %cst {dimension_numbers = #tpu.dot_dimension_numbers<[1], [0], [0], [1], [0, 0, 1, 1], [], []>} : vector<2x4xbf16>, vector<4x16xbf16>, vector<2x16xf32> -> vector<2x16xf32>
    %11 = vector.broadcast %5 : vector<2x1xf32> to vector<2x16xf32>
    %12 = arith.addf %10, %11 : vector<2x16xf32>
    %13 = math.tanh %12 : vector<2x16xf32>
    %14 = vector.broadcast %6 : vector<2x1xf32> to vector<2x16xf32>
    %15 = arith.mulf %14, %13 : vector<2x16xf32>
    %cst_9 = arith.constant dense<0.000000e+00> : vector<16xf32>
    %16 = vector.multi_reduction <add>, %15, %cst_9 [0] : vector<2x16xf32> to vector<16xf32>
    %17 = vector.shape_cast %16 : vector<16xf32> to vector<1x16xf32>
    %c0_10 = arith.constant 0 : index
    %c0_11 = arith.constant 0 : index
    %18 = vector.load %arg7[%c0_10, %c0_11] : memref<1x1xf32, #tpu.memory_space<vmem>>, vector<1x1xf32>
    %cst_12 = arith.constant dense<0xFF800000> : vector<1xf32>
    %19 = vector.multi_reduction <maximumf>, %17, %cst_12 [1] : vector<1x16xf32> to vector<1xf32>
    %20 = vector.shape_cast %19 : vector<1xf32> to vector<1x1xf32>
    %21 = arith.maximumf %18, %20 : vector<1x1xf32>
    %22 = vector.broadcast %21 : vector<1x1xf32> to vector<1x16xf32>
    %23 = arith.subf %17, %22 : vector<1x16xf32>
    %24 = math.exp %23 : vector<1x16xf32>
    %c0_13 = arith.constant 0 : index
    %c0_14 = arith.constant 0 : index
    %25 = vector.load %arg8[%c0_13, %c0_14] : memref<1x1xf32, #tpu.memory_space<vmem>>, vector<1x1xf32>
    %26 = arith.subf %18, %21 : vector<1x1xf32>
    %27 = math.exp %26 : vector<1x1xf32>
    %28 = arith.mulf %25, %27 : vector<1x1xf32>
    %cst_15 = arith.constant dense<0.000000e+00> : vector<1xf32>
    %29 = vector.multi_reduction <add>, %24, %cst_15 [1] : vector<1x16xf32> to vector<1xf32>
    %30 = vector.shape_cast %29 : vector<1xf32> to vector<1x1xf32>
    %31 = arith.addf %28, %30 : vector<1x1xf32>
    %c0_16 = arith.constant 0 : index
    %c0_17 = arith.constant 0 : index
    %32 = vector.load %arg8[%c0_16, %c0_17] : memref<1x1xf32, #tpu.memory_space<vmem>>, vector<1x1xf32>
    tpu.vector_store %arg8[%c0_16, %c0_17], %31 {strides = array<i32>} : memref<1x1xf32, #tpu.memory_space<vmem>>, vector<1x1xf32>,
    %c0_18 = arith.constant 0 : index
    %c0_19 = arith.constant 0 : index
    %33 = vector.load %arg7[%c0_18, %c0_19] : memref<1x1xf32, #tpu.memory_space<vmem>>, vector<1x1xf32>
    tpu.vector_store %arg7[%c0_18, %c0_19], %21 {strides = array<i32>} : memref<1x1xf32, #tpu.memory_space<vmem>>, vector<1x1xf32>,
    %34 = arith.index_cast %arg1 : i32 to index
    %c0_20 = arith.constant 0 : index
    %c0_21 = arith.constant 0 : index
    %35 = vector.load %arg9[%34, %c0_20, %c0_21] : memref<1x1x1xf32, #tpu.memory_space<vmem>>, vector<1x1x1xf32>
    %36 = vector.shape_cast %35 : vector<1x1x1xf32> to vector<1x1xf32>
    %37 = vector.shape_cast %21 : vector<1x1xf32> to vector<1x1x1xf32>
    tpu.vector_store %arg9[%34, %c0_20, %c0_21], %37 {strides = array<i32>} : memref<1x1x1xf32, #tpu.memory_space<vmem>>, vector<1x1x1xf32>,
    %c0_22 = arith.constant 0 : index
    %c0_23 = arith.constant 0 : index
    %c0_24 = arith.constant 0 : index
    %38 = vector.load %arg6[%c0_22, %c0_23, %c0_24] : memref<1x1x16xf32, #tpu.memory_space<vmem>>, vector<1x1x16xf32>
    %39 = vector.shape_cast %38 : vector<1x1x16xf32> to vector<1x16xf32>
    %40 = vector.shape_cast %24 : vector<1x16xf32> to vector<1x1x16xf32>
    tpu.vector_store %arg6[%c0_22, %c0_23, %c0_24], %40 {strides = array<i32>} : memref<1x1x16xf32, #tpu.memory_space<vmem>>, vector<1x1x16xf32>,
    %c0_i32_25 = arith.constant 0 : i32
    %41 = arith.cmpi eq, %arg1, %c0_i32_25 : i32
    %42 = arith.extui %41 : i1 to i32
    %c0_i32_26 = arith.constant 0 : i32
    %43 = arith.cmpi ne, %42, %c0_i32_26 : i32
    scf.if %43 {
      %c0_27 = arith.constant 0 : index
      %c0_28 = arith.constant 0 : index
      %44 = vector.load %arg7[%c0_27, %c0_28] : memref<1x1xf32, #tpu.memory_space<vmem>>, vector<1x1xf32>
      %c0_29 = arith.constant 0 : index
      %c0_30 = arith.constant 0 : index
      %45 = vector.load %arg8[%c0_29, %c0_30] : memref<1x1xf32, #tpu.memory_space<vmem>>, vector<1x1xf32>
      %cst_31 = arith.constant 1.000000e+00 : f32
      %46 = vector.broadcast %cst_31 : f32 to vector<1x1xf32>
      %47 = arith.divf %46, %45 : vector<1x1xf32>
      %c0_32 = arith.constant 0 : index
      %c0_33 = arith.constant 0 : index
      %c0_34 = arith.constant 0 : index
      %48 = vector.load %arg6[%c0_32, %c0_33, %c0_34] : memref<1x1x16xf32, #tpu.memory_space<vmem>>, vector<1x1x16xf32>
      %49 = vector.shape_cast %48 : vector<1x1x16xf32> to vector<1x16xf32>
      %c0_35 = arith.constant 0 : index
      %c0_36 = arith.constant 0 : index
      %c0_37 = arith.constant 0 : index
      %50 = vector.load %arg9[%c0_35, %c0_36, %c0_37] : memref<1x1x1xf32, #tpu.memory_space<vmem>>, vector<1x1x1xf32>
      %51 = vector.shape_cast %50 : vector<1x1x1xf32> to vector<1x1xf32>
      %52 = arith.subf %51, %44 : vector<1x1xf32>
      %53 = math.exp %52 : vector<1x1xf32>
      %54 = arith.mulf %53, %47 : vector<1x1xf32>
      %55 = vector.broadcast %54 : vector<1x1xf32> to vector<1x16xf32>
      %56 = arith.mulf %49, %55 : vector<1x16xf32>
      %c0_38 = arith.constant 0 : index
      %c0_39 = arith.constant 0 : index
      %c0_40 = arith.constant 0 : index
      %57 = vector.load %arg6[%c0_38, %c0_39, %c0_40] : memref<1x1x16xf32, #tpu.memory_space<vmem>>, vector<1x1x16xf32>
      %58 = vector.shape_cast %57 : vector<1x1x16xf32> to vector<1x16xf32>
      %59 = vector.shape_cast %56 : vector<1x16xf32> to vector<1x1x16xf32>
      tpu.vector_store %arg6[%c0_38, %c0_39, %c0_40], %59 {strides = array<i32>} : memref<1x1x16xf32, #tpu.memory_space<vmem>>, vector<1x1x16xf32>,
    } else {
    }
    return
  }
  func.func @transform_0(%arg0: i32, %arg1: i32) -> (i32, i32, i32) {
    %c0_i32 = arith.constant 0 : i32
    %c0_i32_0 = arith.constant 0 : i32
    return %arg0, %c0_i32, %arg1 : i32, i32, i32
  }
  func.func @transform_1(%arg0: i32, %arg1: i32) -> (i32, i32) {
    %c0_i32 = arith.constant 0 : i32
    %c0_i32_0 = arith.constant 0 : i32
    %c0_i32_1 = arith.constant 0 : i32
    return %c0_i32, %c0_i32_0 : i32, i32
  }
  func.func @transform_2(%arg0: i32, %arg1: i32) -> (i32, i32) {
    %c0_i32 = arith.constant 0 : i32
    %c0_i32_0 = arith.constant 0 : i32
    %c0_i32_1 = arith.constant 0 : i32
    return %c0_i32, %c0_i32_0 : i32, i32
  }
  func.func @transform_3(%arg0: i32, %arg1: i32) -> (i32, i32) {
    %c0_i32 = arith.constant 0 : i32
    %c0_i32_0 = arith.constant 0 : i32
    %c0_i32_1 = arith.constant 0 : i32
    return %c0_i32, %c0_i32_0 : i32, i32
  }
  func.func @transform_4(%arg0: i32, %arg1: i32) -> (i32, i32, i32) {
    %c0_i32 = arith.constant 0 : i32
    %c0_i32_0 = arith.constant 0 : i32
    %c0_i32_1 = arith.constant 0 : i32
    return %arg0, %c0_i32, %c0_i32_0 : i32, i32, i32
  }
}

</mosaic_0001>

<bundles_post_ra>
// kernel: tpu_custom_call.1
= control target key start
LH: loop header
LB: loop body
LE: loop exit
PB: predicated region body
PF: predicated region fallthrough
CT: control target
= control target key end

     0   :  { %9 = vsyncpa [#allocation6], 0  ;;  %s854_s0 = inlined_call_operand.hbm [shape: f32[2,4,16], index: 0, kind: input, shape index: {}]   ;;  %s855_s1 = inlined_call_operand.vmem [shape: f32[2,4], index: 1, kind: input, shape index: {}]   ;;  %s856_s2 = inlined_call_operand.vmem [shape: f32[2,1], index: 2, kind: input, shape index: {}]   ;;  %s857_s3 = inlined_call_operand.vmem [shape: f32[2,1], index: 3, kind: input, shape index: {}]   ;;  %s858_s4 = inlined_call_operand.hbm [shape: f32[2,1,16], index: 4, kind: output, shape index: {}]  }
   0x1   :  { %11 = vsyncpa [#allocation6 + $0x1], 0 }
   0x2   :  { %12 = vsyncpa [#allocation7], 0 }
   0x3   :  { %14 = vsyncpa [#allocation7 + $0x1], 0  ;;  %s695_s15 = smov 0   ;;  %s697_s16 = smov 0  }
   0x4   :  { %s699_s17 = smov 0   ;;  %s701_s18 = smov 0  }
   0x5   :  { %s703_s19 = smov 0   ;;  %s705_s20 = smov 0  }
   0x6 LB: > { %s456_s21 = sadd.s32 4294967295, %s662_s20   ;;  %s457_s22 = sadd.s32 4294967294, %s662_s20   ;;  %s662_s20 = sphi %s705_s20, %s20_s20   ;;  %s658_s19 = sphi %s703_s19, %s870_s19   ;;  %s654_s18 = sphi %s701_s18, %s869_s18   ;;  %s650_s17 = sphi %s699_s17, %s868_s17   ;;  %s646_s16 = sphi %s697_s16, %s867_s16   ;;  %s642_s15 = sphi %s695_s15, %s866_s15  }
   0x7   : > { %s32_s23 = sadd.s32 1, %s658_s19  ;;  %s41_s24 = sadd.s32 1, %s650_s17 }
   0x8   : > { %p34_p0 = scmp.ge.s32.totalorder %s32_s23, 2  ;;  %p48_p1 = scmp.ne.s32.totalorder %s650_s17, %s646_s16 }
   0x9   : > { %p49_p2 = scmp.eq.s32.totalorder %s662_s20, 0  ;;  %p54_p3 = scmp.ne.s32.totalorder %s646_s16, %s642_s15 }
   0xa   : > { %s872_s23 = smov (%p34_p0, %s32_s23), 0  ;;  %p55_p5 = scmp.eq.s32.totalorder %s456_s21, 0 }
   0xb   : > { %p736_p4 = por %p49_p2, %p48_p1  ;;  %s36_s26 = ssub.s32 %s658_s19, %s872_s23 }
   0xc   : > { %p141_p6 = scmp.eq.s32.totalorder %s456_s21, 1  ;;  %p39_p7 = scmp.eq.s32.totalorder %s36_s26, 0 }
   0xd   : > { %p742_p8 = por %p55_p5, %p54_p3  ;;  %p147_p10 = scmp.eq.s32.totalorder %s457_s22, 1 }
   0xe   : > { %p746_p9 = por %p141_p6, %p48_p1  ;;  %p488_p13 = scmp.lt.s32.totalorder %s662_s20, 2 }
   0xf   : > { %s751_s29 = scalar_select %p39_p7, %s650_s17, %s41_s24  }
  0x10   : > { %p753_p11 = por %p147_p10, %p54_p3  ;;  %s176_s5 = sand.u32 1, %s650_s17  }
  0x11   : > { %s460_s6 = sshll.u32 %s176_s5, 2  ;;  %s461_s7 = sshll.u32 %s658_s19, 6 }
  0x12   : > { %s862_s30 = scalar_select %p753_p11, 1, 0 }
  0x13   : > { %s186_s10 = scalar_lea.hbm %s854_s0, %s461_s7  ;;  %s180_s11 = scalar_lea.vmem [#allocation5], %s460_s6 }
  0x14   : > { %s188_s12 = sshll.u32 %s180_s11, 4  ;;  %p766_p0 = pnand %p488_p13, %p736_p4  ;;  %s189_s12 = int_to_ptr.vmem [resolvable:$true] %s188_s12 }
  0x15   : > { %p462_p1 = scmp.ge.s32.totalorder %s662_s20, 1  ;;  %p193_p2 = scmp.lt.s32.totalorder %s662_s20, 3 }
  0x16   : > { %s177_s14 = scalar_lea.sflag [#allocation6], %s176_s5  ;;  %p556_p3 = pneg %p766_p0 }
  0x17   : > { %s567_s21 = scalar_lea.vmem %s189_s12, 64  ;;  %s664_s22 = smov [#allocation5]  }
  0x18   : > { %p568_p5 = scmp.ne.s32.totalorder %s189_s12, %s567_s21  ;;  %s572_s24 = sshll.u32 %s664_s22, 4  ;;  %s573_s24 = int_to_ptr.vmem [resolvable:$false] %s572_s24 }
  0x19   : > { %s574_s26 = scalar_lea.vmem %s573_s24, 128  ;;  %p575_p10 = scmp.lt.s32.totalorder %s189_s12, %s573_s24 }
  0x1a   : > { %p570_p6 = pnand %p568_p5, %p556_p3  ;;  %p576_p12 = scmp.lt.s32.totalorder %s574_s26, %s567_s21 }
  0x1c   : > { %p571_p7 = pneg %p570_p6  ;;  %p577_p4 = por %p576_p12, %p575_p10 }
  0x1e   : > { %p578_p13 = pnand %p577_p4, %p571_p7 }
  0x20   : > { %581 = shalt.err (!%p578_p13)
}
  0x21   : > { %483 = dma.hbm_to_vmem [thread:$0]  (!%p766_p0), %s186_s10, 64, %s189_s12, %s177_s14  }
  0x22   : > { %p194_p11 = pnand %p462_p1, %p193_p2 }
  0x23   : > { %s781_s25 = sand.u32 (!%p194_p11), 1, %s646_s16  }
  0x24   : > { %197 = sbr.rel (%p194_p11) target bundleno = 865 (0x361), region = 36  ;;  %s463_s5 = sshll.u32 (!%p194_p11), %s781_s25, 2 }
  0x25   : > { %s200_s6 = scalar_lea.sflag (!%p194_p11), [#allocation6], %s781_s25  ;;  %s203_s7 = scalar_lea.vmem (!%p194_p11), [#allocation5], %s463_s5 }
  0x29   : > { %633 = dma.done.wait (%p742_p8), %s200_s6, 64  }
  0x2a   : > { %635 = vsyncadd (%p742_p8), %s200_s6, 4294967232  ;;  %vm232_vm0 = vcmask 0   ;;  %v665_v0 = vmov 0.0   ;;  %vm666_vm1 = vmmov 0   ;;  %v667_v1 = vmov 0   ;;  %s805_s13 = scalar_lea.vmem [#allocation8], %s781_s25 }
  0x2b   : > { %234 = vst.msk [vmem:[#allocation3] sm:$0x1] %vm232_vm0, %v665_v0  ;;  %470 = vmatprep.subr.bf16.mxu0 %v665_v0  ;;  %472 = vmatprep.mubr.msk.bf16.mxu0 %vm666_vm1, %v665_v0  ;;  %vm250_vm2 = vcmask 1041408   ;;  %v239_v2 = vld [vmem:[%s203_s7] sm:$0xf]  ;;  %vm246_vm3 = vcmask 31744   ;;  %v320_v31 = vlaneseq }
  0x2c   : > { %542 = vset.pattern.permute.xlu0 %v667_v1  ;;  %543 = vset.pattern.permute.xlu1 %v667_v1  ;;  %v235_v3 = vld [vmem:[%s855_s1] sm:$0x3]  ;;  %v240_v5 = vpack.c.bf16 %v239_v2, %v239_v2  ;;  %v668_v9 = vmov -1e+30   ;;  %vm301_vm4 = vcmask 123904   ;;  %vm310_vm5 = vcmask 130048  }
  0x2d   : > { %v237_v4 = vld [vmem:[%s856_s2] sm:$0x3]  ;;  %v236_v8 = vpack.c.bf16 %v235_v3, %v235_v3  ;;  %233 = vst.msk [vmem:[#allocation2] sm:$0x1] %vm232_vm0, %v668_v9  ;;  %v321_v32 = vshrl.u32 %v320_v31, 7  ;;  %vm341_vm6 = vcmask 122880  }
  0x2e   : > { %243 = vperm.xlu0 %542, %v237_v4   ;;  %v238_v6 = vld [vmem:[%s857_s3] sm:$0x3]  ;;  %v252_v7 = vsel %vm250_vm2, %v240_v5, 0  ;;  %s465_s14 = sshll.u32 %s654_s18, 4  ;;  %s380_s21 = sshll.u32 %s805_s13, 4  ;;  %s381_s21 = int_to_ptr.vmem [resolvable:$true] %s380_s21 }
  0x2f   : > { %471 = vmatpush3.bf16.msra.mxu0 %v252_v7  ;;  %v322_v33 = vsub.s32 0, %v321_v32  ;;  %s378_s26 = scalar_lea.hbm %s858_s4, %s465_s14  ;;  %s368_s5 = scalar_lea.sflag [#allocation7], %s781_s25 }
  0x30   : > { %s582_s6 = scalar_lea.vmem %s381_s21, 16  ;;  %s669_s7 = smov [#allocation8]  }
  0x31   : > { %p583_p8 = scmp.ne.s32.totalorder %s381_s21, %s582_s6  ;;  %s586_s8 = sshll.u32 %s669_s7, 4  ;;  %s587_s8 = int_to_ptr.vmem [resolvable:$false] %s586_s8 }
  0x32   : > { %297 = vperm.xlu0 %542, %v238_v6   ;;  %473 = vmatmul.mubr.msk.bf16.vlgmr.msra.gmra.mxu0 %vm246_vm3, %v236_v8  ;;  %v327_v42 = vld [vmem:[#allocation3] sm:$0x1]  ;;  %s588_s18 = scalar_lea.vmem %s587_s8, 32  ;;  %p589_p0 = scmp.lt.s32.totalorder %s381_s21, %s587_s8 }
  0x33   : > { %p584_p11 = pnand %p583_p8, %p746_p9  ;;  %p590_p1 = scmp.lt.s32.totalorder %s588_s18, %s582_s6 }
  0x34   : > { %v309_v27 = vld [vmem:[#allocation2] sm:$0x1] }
  0x35   : > { %p585_p12 = pneg %p584_p11  ;;  %p591_p2 = por %p590_p1, %p589_p0 }
  0x37   : > { %p592_p3 = pnand %p591_p2, %p585_p12 }
  0xa9   : > { %v244_v10 = vpop.permute.xlu0 %243 }
  0xad   : > { %v298_v17 = vpop.permute.xlu0 %297 }
  0xf2   : > { %v288_v11 = vpop.f32.mrf.mxu0 }
  0xf3   : > { %v289_v12 = vadd.f32 %v288_v11, %v244_v10 }
  0xf4   : > { %v474_v13 = vpop.f32.mrf.mxu0 }
  0xf5   : > { %544 = vtanh.f32 %v289_v12 }
  0xf6   : > { %v291_v14 = vpop.f32.mrf.mxu0 }
  0xf8   : > { %v475_v15 = vpop.f32.mrf.mxu0 }
 0x102   : > { %v545_v16 = vpop.eup %544 }
 0x103   : > { %v300_v18 = vmul.f32 %v545_v16, %v298_v17 }
 0x105   : > { %v302_v19 = vsel %vm301_vm4, %v300_v18, 0.0 }
 0x106   : > { %v303_v20 = vrot.slane %v302_v19, 4 }
 0x108   : > { %v304_v21 = vadd.f32 %v303_v20, %v302_v19 }
 0x10a   : > { %v305_v22 = vrot.slane %v304_v21, 2 }
 0x10c   : > { %v306_v23 = vadd.f32 %v305_v22, %v304_v21 }
 0x10e   : > { %v307_v24 = vrot.slane %v306_v23, 1 }
 0x110   : > { %v308_v25 = vadd.f32 %v307_v24, %v306_v23 }
 0x112   : > { %v311_v26 = vsel %vm310_vm5, %v308_v25, -inf }
 0x113   : > { %312 = vmax.xlane.f32.xlu1 %v311_v26 }
 0x19c   : > { %v313_v28 = vpop.xlane.xlu1 %312 }
 0x19d   : > { %v314_v29 = vmax.f32 %v309_v27, %v313_v28 }
 0x19f   : > { %v328_v30 = vsub.f32 %v309_v27, %v314_v29  ;;  %338 = vst.msk [vmem:[#allocation2] sm:$0x1] %vm232_vm0, %v314_v29  ;;  %340 = vst.msk [vmem:[#allocation4] sm:$0x1] %vm232_vm0, %v314_v29  ;;  %317 = vperm.xlu1 %543, %v314_v29  }
 0x1a1   : > { %v329_v40 = vmul.f32 1.442695, %v328_v30 }
 0x1a6   : > { %v346_v44 = vld [vmem:[#allocation2] sm:$0x1]  ;;  %v351_v45 = vld [vmem:[#allocation4] sm:$0x1] }
 0x1a7   : > { %v352_v48 = vsub.f32 %v351_v45, %v346_v44 }
 0x1a9   : > { %v353_v49 = vmul.f32 1.442695, %v352_v48 }
 0x21a   : > { %v318_v34 = vpop.permute.xlu1 %317 }
 0x21b   : > { %v323_v35 = vrot.slane %v318_v34, %v322_v33 }
 0x21d   : > { %v324_v36 = vsub.f32 %v308_v25, %v323_v35 }
 0x21f   : > { %v325_v37 = vmul.f32 1.442695, %v324_v36 }
 0x221   : > { %546 = vpow2.f32 %v325_v37 }
 0x222   : > { %548 = vpow2.f32 %v329_v40 }
 0x223   : > { %550 = vpow2.f32 %v353_v49 }
 0x22e   : > { %v547_v38 = vpop.eup %546 }
 0x22f   : > { %v332_v39 = vsel %vm310_vm5, %v547_v38, 0.0  ;;  %342 = vst.msk [vmem:[%s805_s13] sm:$0x1] %vm341_vm6, %v547_v38  ;;  %v549_v41 = vpop.eup %548 }
 0x230   : > { %333 = vadd.xlane.f32.xlu0 %v332_v39  ;;  %v331_v43 = vmul.f32 %v549_v41, %v327_v42  ;;  %v551_v51 = vpop.eup %550 }
 0x236   : > { %v350_v56 = vld [vmem:[%s805_s13] sm:$0x1] }
 0x2b9   : > { %v334_v46 = vpop.xlane.xlu0 %333 }
 0x2ba   : > { %v335_v47 = vadd.f32 %v334_v46, %v331_v43 }
 0x2bc   : > { %337 = vst.msk [vmem:[#allocation3] sm:$0x1] %vm232_vm0, %v335_v47 }
 0x2c3   : > { %v347_v50 = vld [vmem:[#allocation3] sm:$0x1] }
 0x2c4   : > { %552 = vrcp.f32 %v347_v50 }
 0x2d1   : > { %v553_v52 = vpop.eup %552 }
 0x2d2   : > { %v355_v53 = vmul.f32 %v553_v52, %v551_v51 }
 0x2d4   : > { %358 = vperm.xlu1 %543, %v355_v53  }
 0x34f   : > { %v359_v54 = vpop.permute.xlu1 %358 }
 0x350   : > { %v364_v55 = vrot.slane %v359_v54, %v322_v33 }
 0x352   : > { %v365_v57 = vmul.f32 %v364_v55, %v350_v56 }
 0x354   : > { %366 = vst.msk [vmem:[%s805_s13] sm:$0x1] %vm341_vm6, %v365_v57 }
 0x355   : > { %595 = shalt.err (!%p592_p3)
}
 0x356   : > { %s596_s9 = scalar_lea.hbm %s378_s26, 16  ;;  %s600_s11 = scalar_lea.hbm %s858_s4, 32 }
 0x357   : > { %p597_p5 = scmp.ne.s32.totalorder %s378_s26, %s596_s9  ;;  %p601_p10 = scmp.lt.s32.totalorder %s378_s26, %s858_s4 }
 0x358   : > { %p602_p4 = scmp.lt.s32.totalorder %s600_s11, %s596_s9 }
 0x359   : > { %p598_p6 = pnand %p597_p5, %p746_p9 }
 0x35a   : > { %p603_p13 = por %p602_p4, %p601_p10 }
 0x35b   : > { %p599_p7 = pneg %p598_p6 }
 0x35d   : > { %p604_p8 = pnand %p603_p13, %p599_p7 }
 0x35f   : > { %607 = shalt.err (!%p604_p8)
}
 0x360   : > { %478 = dma.vmem_to_hbm [thread:$0]  (%p746_p9), %s381_s21, 16, %s378_s26, %s368_s5  }
 0x361 PF: > { %s392_s13 = sand.u32 1, %s642_s15   ;;  %p864_p11 = scmp.ne.s32.totalorder %s862_s30, 0 }
 0x362   : > { %p865_p12 = scmp.ge.s32.totalorder %s662_s20, 2  ;;  %s393_s14 = scalar_lea.sflag [#allocation7], %s392_s13 }
 0x364   : > { %p485_p0 = pnand %p865_p12, %p864_p11 }
 0x366   : > { %p486_p1 = pneg %p485_p0 }
 0x368   : > { %637 = dma.done.wait (%p486_p1), %s393_s14, 16  }
 0x369   : > { %639 = vsyncadd (%p486_p1), %s393_s14, 4294967280  ;;  %s20_s20 = sadd.s32 1, %s662_s20   ;;  %s866_s15 = smov %s646_s16 }
 0x36a   : > { %p17_p2 = scmp.ge.s32.totalorder %s20_s20, 4   ;;  %s867_s16 = smov %s650_s17 }
 0x36b   : > { %s868_s17 = smov %s751_s29  ;;  %s869_s18 = smov %s658_s19 }
 0x36c   : > { %s870_s19 = smov %s872_s23  ;;  %19 = sbr.rel (!%p17_p2) target bundleno = 6 (0x6), region = 90 }
 0x371   :  { %397 = vsyncpa [#allocation6], 1 }
 0x372   :  { %399 = vsyncpa [#allocation6 + $0x1], 1 }
 0x373   :  { %400 = vsyncpa [#allocation7], 1 }
 0x374   :  { %402 = vsyncpa [#allocation7 + $0x1], 1 }

</bundles_post_ra>
